<compile_context>
chip_gen: v5e
topology: v5e:2x2
jax: 0.10.0
libtpu: 0.0.40
codegen_flags: <defaults>
</compile_context>

<pallas_src>
import jax
import jax.numpy as jnp
import numpy as np
from jax import lax
from jax.experimental import pallas as pl
from jax.experimental.pallas import tpu as pltpu


# ---------------------------------------------------------------------------
# Kernel
# ---------------------------------------------------------------------------
def _build_kernel(H, W, tile_rows, halo_row):
    """Per-strip kernel. Refs (leading P axis squeezed by BlockSpec):
       x_ref: (2, tH, Wp), halo_ref: (2, halo_bh, Wp), o_ref: (3, tH, Wp).
       W is the true (unpadded) width; Wp may be lane-padded."""

    def kernel(x_ref, halo_ref, o_ref):
        s = pl.program_id(1)                       # strip index along H
        x0 = x_ref[0]                              # (tH, Wp) y-component
        x1 = x_ref[1]                              # (tH, Wp) x-component
        tH, Wp = x0.shape
        dtype = x0.dtype
        zero = jnp.zeros((), dtype)

        # Row just above this strip (zeroed for the first strip) — one small
        # (2, 1, Wp) select instead of full-tile selects per component.
        halo = halo_ref[...]                       # (2, halo_bh, Wp)
        hrow = halo[:, halo_row:halo_row + 1, :]   # (2, 1, Wp)
        hrow = jnp.where(s == 0, jnp.zeros_like(hrow), hrow)
        h0 = hrow[0]
        h1 = hrow[1]

        # Masks computed once and reused across both components.
        rid = lax.broadcasted_iota(jnp.int32, (tH, Wp), 0)
        cid = lax.broadcasted_iota(jnp.int32, (tH, Wp), 1)
        row0 = rid == 0
        # Global last row expressed as a local index (scalar) — avoids a
        # full-tile int32 add for the global row index.
        last_local = (H - 1) - s * tile_rows
        row_last = rid == last_local
        col0 = cid == 0
        col_last = cid == (W - 1)                  # true (unpadded) width

        def d_rows(a, top):
            prev = pltpu.roll(a, shift=1, axis=0)
            prev = jnp.where(row0, top, prev)      # broadcast (1, Wp) halo row
            cur = jnp.where(row_last, zero, a)
            return prev - cur

        def d_cols(a):
            prev = pltpu.roll(a, shift=1, axis=1)
            prev = jnp.where(col0, zero, prev)
            cur = jnp.where(col_last, zero, a)
            return prev - cur

        o_ref[0] = d_rows(x0, h0).astype(o_ref.dtype)
        o_ref[1] = d_cols(x1).astype(o_ref.dtype)
        o_ref[2] = ((d_cols(x0) + d_rows(x1, h1))
                    * jnp.asarray(0.5, dtype)).astype(o_ref.dtype)

    return kernel


# ---------------------------------------------------------------------------
# Tiling / VMEM planning
# ---------------------------------------------------------------------------
def _sublane_pack(dtype):
    """Sublane packing: 8 rows for 32-bit, 16 for bf16/fp16, 32 for int8/fp8."""
    itemsize = jnp.dtype(dtype).itemsize
    return 8 * max(1, 4 // max(itemsize, 1))


def _plan_tiles(H, W, dtype, tile_rows=None):
    """Returns (tile_rows, num_strips, halo_bh, vmem_limit_bytes)."""
    itemsize = jnp.dtype(dtype).itemsize
    pack = _sublane_pack(dtype)
    halo_bh = min(pack, H)

    try:
        vmem_physical = pltpu.get_tpu_info().vmem_capacity_bytes
    except Exception:
        vmem_physical = 64 * 1024 * 1024          # v7x per-TC VMEM (fleet minimum)

    # Budget ~25% of physical VMEM for the double-buffered main blocks; the rest
    # is headroom for halo buffers, iota/roll/select temporaries and spills.
    budget = vmem_physical // 4
    halo_bytes = 2 * 2 * halo_bh * W * itemsize   # double-buffered (2, halo_bh, W)
    # per strip row: 2x-buffered in (2 planes) + out (3 planes), plus ~6 (row, W)
    # 32-bit temporaries live inside the body.
    bytes_per_row = 2 * (2 + 3) * W * itemsize + 6 * W * 4
    vmem_rows = max(pack, int((budget - halo_bytes) // max(bytes_per_row, 1)))

    if tile_rows is not None:
        tH = max(1, min(int(tile_rows), H))
        if tH < H:
            tH = max(pack, (tH // pack) * pack)
    elif H <= pack:
        tH = H                                    # tiny image: single strip
    else:
        # >= 512 rows already reaches ~85% of HBM roofline; cap so the grid has
        # multiple steps (pipelining + 2-TC sharding on v7x).
        cap = min(512, vmem_rows)
        cap = max(pack, (cap // pack) * pack)
        n = max(2, pl.cdiv(H, cap))               # at least 2 strips
        if n % 2:
            n += 1                                # even strip count balances v7x cores
        tH = pack * pl.cdiv(pl.cdiv(H, n), pack)
        tH = min(tH, H)

    num_strips = pl.cdiv(H, tH)

    # Scoped-VMEM limit consistent with the actual tile choice (with margin).
    block_bytes = 2 * (2 + 3) * tH * W * itemsize + halo_bytes
    vmem_limit = int(min(vmem_physical, max(32 * 1024 * 1024, 2 * block_bytes)))
    return tH, num_strips, halo_bh, vmem_limit


# ---------------------------------------------------------------------------
# Wrapper
# ---------------------------------------------------------------------------
def _nabla_sym_2d_stacked(x, *, tile_rows=None):
    """x: (P, 2, H, W) real -> (P, 3, H, W). P is real/imag (or 1)."""
    P, K, H, W = x.shape
    assert K == 2

    # Lane-dense store path: pad narrow images up to one full 128-lane register
    # (sub-128 output widths lower to masked partial stores). Sliced back below.
    Wp = 128 if W < 128 else W
    xp = jnp.pad(x, ((0, 0), (0, 0), (0, 0), (0, Wp - W))) if Wp != W else x

    tH, num_strips, halo_bh, vmem_limit = _plan_tiles(H, Wp, x.dtype, tile_rows)
    bps = max(tH // halo_bh, 1)                   # halo blocks per strip
    halo_row = halo_bh - 1

    kernel = _build_kernel(H=H, W=W, tile_rows=tH, halo_row=halo_row)

    out = pl.pallas_call(
        kernel,
        out_shape=jax.ShapeDtypeStruct((P, 3, H, Wp), x.dtype),
        grid=(P, num_strips),
        in_specs=[
            pl.BlockSpec((None, 2, tH, Wp), lambda p, i: (p, 0, i, 0)),
            # halo: small block whose last row is the row just above strip i
            pl.BlockSpec((None, 2, halo_bh, Wp),
                         lambda p, i: (p, 0, jnp.maximum(i * bps - 1, 0), 0)),
        ],
        out_specs=pl.BlockSpec((None, 3, tH, Wp), lambda p, i: (p, 0, i, 0)),
        compiler_params=pltpu.CompilerParams(
            # NOTE(v7x): if plain "parallel" does not shard the strip axis across
            # both TensorCores, switch the strip axis to pltpu.CORE_PARALLEL.
            dimension_semantics=("parallel", "parallel"),
            vmem_limit_bytes=vmem_limit,
        ),
    )(xp, xp)                                      # same array twice: strip + halo

    if Wp != W:
        out = out[..., :W]
    return out


def nabla_sym_2d_parts(x_parts, *, tile_rows=None):
    """(P, 2, H, W) real -> (P, 3, H, W). Keeps the stacked real/imag f32 layout
    so downstream consumers of complex data can skip the recombine pass."""
    return _nabla_sym_2d_stacked(x_parts, tile_rows=tile_rows)


def nabla_sym_2d(x, *, tile_rows=None):
    """JAX/Pallas equivalent of medutils nabla_sym(x, mode='2d')."""
    assert x.ndim == 3 and x.ndim - 1 == x.shape[0], "2d mode expects x of shape (2, H, W)"
    if jnp.iscomplexobj(x):
        # TODO(synk): lax.bitcast_convert_type rejects complex dtypes, so the
        # split (real/imag) and recombine passes cannot be folded into the
        # kernel; prefer nabla_sym_2d_parts downstream to avoid the recombine.
        parts = jnp.stack([jnp.real(x), jnp.imag(x)])            # (2, 2, H, W)
        out = _nabla_sym_2d_stacked(parts, tile_rows=tile_rows)  # (2, 3, H, W)
        return lax.complex(out[0], out[1]).astype(x.dtype)
    return _nabla_sym_2d_stacked(x[None], tile_rows=tile_rows)[0]


class NablaSym:
    """JAX/Pallas port of medutils NablaSym (forward only). No learned parameters."""

    def __init__(self, mode="2d", beta=None):
        self.mode = mode
        self.beta = beta

    def __call__(self, x):
        if self.mode != "2d":
            # TODO(synk): '2dt'/'3d' modes (4-D time+space symmetric gradient) not ported.
            raise NotImplementedError(f"NablaSym Pallas kernel: mode {self.mode} not implemented")
        return nabla_sym_2d(x)


# --- pure-JAX reference (mirrors backward_differences_dim exactly) ---
def _bwd_diff_ref(a, axis):
    s = a.shape[axis]
    head = lax.slice_in_dim(a, 0, s - 1, axis=axis)
    zeros = jnp.zeros_like(lax.slice_in_dim(a, 0, 1, axis=axis))
    prev = jnp.concatenate([zeros, head], axis=axis)
    cur = jnp.concatenate([head, zeros], axis=axis)
    return prev - cur


def _nabla_sym_2d_ref(x):
    wyy = _bwd_diff_ref(x[0], 0)
    wxx = _bwd_diff_ref(x[1], 1)
    wyx = (_bwd_diff_ref(x[0], 1) + _bwd_diff_ref(x[1], 0)) / 2.0
    return jnp.stack([wyy, wxx, wyx])


if __name__ == "__main__":
    key = jax.random.PRNGKey(0)
    k1, k2, k3, k4, k5 = jax.random.split(key, 5)
    module = NablaSym(mode="2d")

    # 1) small real input — default planner now gives 2 strips + lane padding
    x = jax.random.normal(k1, (2, 16, 16), dtype=jnp.float32)
    out = jax.block_until_ready(module(x))
    np.testing.assert_allclose(np.asarray(out), np.asarray(_nabla_sym_2d_ref(x)),
                               rtol=1e-5, atol=1e-5)
    assert out.shape == (3, 16, 16) and out.dtype == x.dtype

    # 2) explicit multi-strip path (1-row halo between strips), lane-dense W
    x2 = jax.random.normal(k2, (2, 64, 128), dtype=jnp.float32)
    out2 = jax.block_until_ready(nabla_sym_2d(x2, tile_rows=16))
    np.testing.assert_allclose(np.asarray(out2), np.asarray(_nabla_sym_2d_ref(x2)),
                               rtol=1e-5, atol=1e-5)

    # 3) non-divisible H (partial last strip) and narrow W (lane padding)
    x3 = jax.random.normal(k3, (2, 70, 96), dtype=jnp.float32)
    out3 = jax.block_until_ready(nabla_sym_2d(x3, tile_rows=32))
    np.testing.assert_allclose(np.asarray(out3), np.asarray(_nabla_sym_2d_ref(x3)),
                               rtol=1e-5, atol=1e-5)

    # 4) bf16 input (dtype-dependent 16-row halo / strip packing)
    x4 = jax.random.normal(k4, (2, 48, 128), dtype=jnp.float32).astype(jnp.bfloat16)
    out4 = jax.block_until_ready(module(x4))
    ref4 = _nabla_sym_2d_ref(x4)
    np.testing.assert_allclose(np.asarray(out4.astype(jnp.float32)),
                               np.asarray(ref4.astype(jnp.float32)),
                               rtol=1e-2, atol=1e-2)
    assert out4.dtype == x4.dtype

    # 5) complex input (real + imag fused into one pallas_call)
    xc = (jax.random.normal(k5, (2, 16, 16), dtype=jnp.float32)
          + 1j * jax.random.normal(k1, (2, 16, 16), dtype=jnp.float32)).astype(jnp.complex64)
    outc = jax.block_until_ready(module(xc))
    refc = (_nabla_sym_2d_ref(jnp.real(xc))
            + 1j * _nabla_sym_2d_ref(jnp.imag(xc))).astype(jnp.complex64)
    np.testing.assert_allclose(np.asarray(outc), np.asarray(refc), rtol=1e-5, atol=1e-5)
    assert outc.dtype == xc.dtype

    print("KERNEL_OK")
</pallas_src>

<mosaic_0001>
module attributes {stable_mosaic.version = 11 : i64} {
  func.func @kernel(%arg0: i32, %arg1: i32, %arg2: memref<1x2x8x128xf32, #tpu.memory_space<vmem>>, %arg3: memref<1x2x8x128xf32, #tpu.memory_space<vmem>>, %arg4: memref<1x3x8x128xf32, #tpu.memory_space<vmem>>) attributes {dimension_semantics = [#tpu.dimension_semantics<parallel>, #tpu.dimension_semantics<parallel>], iteration_bounds = array<i64: 1, 2>, scalar_prefetch = 0 : i64, scratch_operands = 0 : i64, tpu.core_type = #tpu.core_type<tc>, window_params = [{transform_indices = @transform_0, window_bounds = array<i64: 1, 2, 8, 128>}, {transform_indices = @transform_1, window_bounds = array<i64: 1, 2, 8, 128>}, {transform_indices = @transform_2, window_bounds = array<i64: 1, 3, 8, 128>}]} {
    %c0 = arith.constant 0 : index
    %c0_0 = arith.constant 0 : index
    %c0_1 = arith.constant 0 : index
    %c0_2 = arith.constant 0 : index
    %0 = vector.load %arg2[%c0, %c0_0, %c0_1, %c0_2] : memref<1x2x8x128xf32, #tpu.memory_space<vmem>>, vector<1x1x8x128xf32>
    %1 = vector.shape_cast %0 : vector<1x1x8x128xf32> to vector<8x128xf32>
    %c0_3 = arith.constant 0 : index
    %c1 = arith.constant 1 : index
    %c0_4 = arith.constant 0 : index
    %c0_5 = arith.constant 0 : index
    %2 = vector.load %arg2[%c0_3, %c1, %c0_4, %c0_5] : memref<1x2x8x128xf32, #tpu.memory_space<vmem>>, vector<1x1x8x128xf32>
    %3 = vector.shape_cast %2 : vector<1x1x8x128xf32> to vector<8x128xf32>
    %c0_6 = arith.constant 0 : index
    %c0_7 = arith.constant 0 : index
    %c0_8 = arith.constant 0 : index
    %c0_9 = arith.constant 0 : index
    %4 = vector.load %arg3[%c0_6, %c0_7, %c0_8, %c0_9] : memref<1x2x8x128xf32, #tpu.memory_space<vmem>>, vector<1x2x8x128xf32>
    %5 = vector.shape_cast %4 : vector<1x2x8x128xf32> to vector<2x8x128xf32>
    %6 = vector.extract_strided_slice %5 {offsets = [0, 7, 0], sizes = [2, 1, 128], strides = [1, 1, 1]} : vector<2x8x128xf32> to vector<2x1x128xf32>
    %c0_i32 = arith.constant 0 : i32
    %7 = arith.cmpi eq, %arg1, %c0_i32 : i32
    %cst = arith.constant 0.000000e+00 : f32
    %8 = vector.broadcast %cst : f32 to vector<2x1x128xf32>
    %9 = arith.select %7, %8, %6 : vector<2x1x128xf32>
    %10 = vector.extract_strided_slice %9 {offsets = [0, 0, 0], sizes = [1, 1, 128], strides = [1, 1, 1]} : vector<2x1x128xf32> to vector<1x1x128xf32>
    %11 = vector.shape_cast %10 : vector<1x1x128xf32> to vector<1x128xf32>
    %12 = vector.extract_strided_slice %9 {offsets = [1, 0, 0], sizes = [1, 1, 128], strides = [1, 1, 1]} : vector<2x1x128xf32> to vector<1x1x128xf32>
    %13 = vector.shape_cast %12 : vector<1x1x128xf32> to vector<1x128xf32>
    %14 = tpu.iota {dimensions = array<i32: 0>} : vector<8x128xi32>
    %15 = tpu.iota {dimensions = array<i32: 1>} : vector<8x128xi32>
    %c0_i32_10 = arith.constant 0 : i32
    %16 = vector.broadcast %c0_i32_10 : i32 to vector<8x128xi32>
    %17 = arith.cmpi eq, %14, %16 : vector<8x128xi32>
    %c8_i32 = arith.constant 8 : i32
    %18 = arith.muli %arg1, %c8_i32 : i32
    %c15_i32 = arith.constant 15 : i32
    %19 = arith.subi %c15_i32, %18 : i32
    %20 = vector.broadcast %19 : i32 to vector<8x128xi32>
    %21 = arith.cmpi eq, %14, %20 : vector<8x128xi32>
    %c0_i32_11 = arith.constant 0 : i32
    %22 = vector.broadcast %c0_i32_11 : i32 to vector<8x128xi32>
    %23 = arith.cmpi eq, %15, %22 : vector<8x128xi32>
    %c15_i32_12 = arith.constant 15 : i32
    %24 = vector.broadcast %c15_i32_12 : i32 to vector<8x128xi32>
    %25 = arith.cmpi eq, %15, %24 : vector<8x128xi32>
    %c1_i32 = arith.constant 1 : i32
    %26 = tpu.dynamic_rotate %1 by %c1_i32 dim 0 : vector<8x128xf32>, i32 -> vector<8x128xf32>
    %27 = vector.shape_cast %11 : vector<1x128xf32> to vector<1x128xf32>
    %28 = vector.broadcast %27 : vector<1x128xf32> to vector<8x128xf32>
    %29 = arith.select %17, %28, %26 : vector<8x128xi1>, vector<8x128xf32>
    %cst_13 = arith.constant 0.000000e+00 : f32
    %30 = vector.broadcast %cst_13 : f32 to vector<8x128xf32>
    %31 = arith.select %21, %30, %1 : vector<8x128xi1>, vector<8x128xf32>
    %32 = arith.subf %29, %31 : vector<8x128xf32>
    %c0_14 = arith.constant 0 : index
    %c0_15 = arith.constant 0 : index
    %c0_16 = arith.constant 0 : index
    %c0_17 = arith.constant 0 : index
    %33 = vector.load %arg4[%c0_14, %c0_15, %c0_16, %c0_17] : memref<1x3x8x128xf32, #tpu.memory_space<vmem>>, vector<1x1x8x128xf32>
    %34 = vector.shape_cast %33 : vector<1x1x8x128xf32> to vector<8x128xf32>
    %35 = vector.shape_cast %32 : vector<8x128xf32> to vector<1x1x8x128xf32>
    tpu.vector_store %arg4[%c0_14, %c0_15, %c0_16, %c0_17], %35 {strides = array<i32>} : memref<1x3x8x128xf32, #tpu.memory_space<vmem>>, vector<1x1x8x128xf32>,
    %c1_i32_18 = arith.constant 1 : i32
    %36 = tpu.dynamic_rotate %3 by %c1_i32_18 dim 1 : vector<8x128xf32>, i32 -> vector<8x128xf32>
    %cst_19 = arith.constant 0.000000e+00 : f32
    %37 = vector.broadcast %cst_19 : f32 to vector<8x128xf32>
    %38 = arith.select %23, %37, %36 : vector<8x128xi1>, vector<8x128xf32>
    %cst_20 = arith.constant 0.000000e+00 : f32
    %39 = vector.broadcast %cst_20 : f32 to vector<8x128xf32>
    %40 = arith.select %25, %39, %3 : vector<8x128xi1>, vector<8x128xf32>
    %41 = arith.subf %38, %40 : vector<8x128xf32>
    %c0_21 = arith.constant 0 : index
    %c1_22 = arith.constant 1 : index
    %c0_23 = arith.constant 0 : index
    %c0_24 = arith.constant 0 : index
    %42 = vector.load %arg4[%c0_21, %c1_22, %c0_23, %c0_24] : memref<1x3x8x128xf32, #tpu.memory_space<vmem>>, vector<1x1x8x128xf32>
    %43 = vector.shape_cast %42 : vector<1x1x8x128xf32> to vector<8x128xf32>
    %44 = vector.shape_cast %41 : vector<8x128xf32> to vector<1x1x8x128xf32>
    tpu.vector_store %arg4[%c0_21, %c1_22, %c0_23, %c0_24], %44 {strides = array<i32>} : memref<1x3x8x128xf32, #tpu.memory_space<vmem>>, vector<1x1x8x128xf32>,
    %c1_i32_25 = arith.constant 1 : i32
    %45 = tpu.dynamic_rotate %1 by %c1_i32_25 dim 1 : vector<8x128xf32>, i32 -> vector<8x128xf32>
    %cst_26 = arith.constant 0.000000e+00 : f32
    %46 = vector.broadcast %cst_26 : f32 to vector<8x128xf32>
    %47 = arith.select %23, %46, %45 : vector<8x128xi1>, vector<8x128xf32>
    %cst_27 = arith.constant 0.000000e+00 : f32
    %48 = vector.broadcast %cst_27 : f32 to vector<8x128xf32>
    %49 = arith.select %25, %48, %1 : vector<8x128xi1>, vector<8x128xf32>
    %50 = arith.subf %47, %49 : vector<8x128xf32>
    %c1_i32_28 = arith.constant 1 : i32
    %51 = tpu.dynamic_rotate %3 by %c1_i32_28 dim 0 : vector<8x128xf32>, i32 -> vector<8x128xf32>
    %52 = vector.shape_cast %13 : vector<1x128xf32> to vector<1x128xf32>
    %53 = vector.broadcast %52 : vector<1x128xf32> to vector<8x128xf32>
    %54 = arith.select %17, %53, %51 : vector<8x128xi1>, vector<8x128xf32>
    %cst_29 = arith.constant 0.000000e+00 : f32
    %55 = vector.broadcast %cst_29 : f32 to vector<8x128xf32>
    %56 = arith.select %21, %55, %3 : vector<8x128xi1>, vector<8x128xf32>
    %57 = arith.subf %54, %56 : vector<8x128xf32>
    %58 = arith.addf %50, %57 : vector<8x128xf32>
    %cst_30 = arith.constant 5.000000e-01 : f32
    %59 = vector.broadcast %cst_30 : f32 to vector<8x128xf32>
    %60 = arith.mulf %58, %59 : vector<8x128xf32>
    %c0_31 = arith.constant 0 : index
    %c2 = arith.constant 2 : index
    %c0_32 = arith.constant 0 : index
    %c0_33 = arith.constant 0 : index
    %61 = vector.load %arg4[%c0_31, %c2, %c0_32, %c0_33] : memref<1x3x8x128xf32, #tpu.memory_space<vmem>>, vector<1x1x8x128xf32>
    %62 = vector.shape_cast %61 : vector<1x1x8x128xf32> to vector<8x128xf32>
    %63 = vector.shape_cast %60 : vector<8x128xf32> to vector<1x1x8x128xf32>
    tpu.vector_store %arg4[%c0_31, %c2, %c0_32, %c0_33], %63 {strides = array<i32>} : memref<1x3x8x128xf32, #tpu.memory_space<vmem>>, vector<1x1x8x128xf32>,
    return
  }
  func.func @transform_0(%arg0: i32, %arg1: i32) -> (i32, i32, i32, i32) {
    %c0_i32 = arith.constant 0 : i32
    %c0_i32_0 = arith.constant 0 : i32
    %c0_i32_1 = arith.constant 0 : i32
    return %arg0, %c0_i32, %arg1, %c0_i32_0 : i32, i32, i32, i32
  }
  func.func @transform_1(%arg0: i32, %arg1: i32) -> (i32, i32, i32, i32) {
    %c1_i32 = arith.constant 1 : i32
    %0 = arith.muli %arg1, %c1_i32 : i32
    %c1_i32_0 = arith.constant 1 : i32
    %1 = arith.subi %0, %c1_i32_0 : i32
    %c0_i32 = arith.constant 0 : i32
    %2 = arith.maxsi %1, %c0_i32 : i32
    %c0_i32_1 = arith.constant 0 : i32
    %c0_i32_2 = arith.constant 0 : i32
    %c0_i32_3 = arith.constant 0 : i32
    return %arg0, %c0_i32_1, %2, %c0_i32_2 : i32, i32, i32, i32
  }
  func.func @transform_2(%arg0: i32, %arg1: i32) -> (i32, i32, i32, i32) {
    %c0_i32 = arith.constant 0 : i32
    %c0_i32_0 = arith.constant 0 : i32
    %c0_i32_1 = arith.constant 0 : i32
    return %arg0, %c0_i32, %arg1, %c0_i32_0 : i32, i32, i32, i32
  }
}

</mosaic_0001>

<bundles_post_ra>
// kernel: tpu_custom_call.1
= control target key start
LH: loop header
LB: loop body
LE: loop exit
PB: predicated region body
PF: predicated region fallthrough
CT: control target
= control target key end

     0   :  { %7 = vsyncpa [#allocation3], 0  ;;  %s918_s0 = inlined_call_operand.hbm [shape: f32[1,2,16,128], index: 0, kind: input, shape index: {}]   ;;  %s919_s1 = inlined_call_operand.hbm [shape: f32[1,2,16,128], index: 1, kind: input, shape index: {}]   ;;  %s920_s2 = inlined_call_operand.hbm [shape: f32[1,3,16,128], index: 2, kind: output, shape index: {}]  }
   0x1   :  { %9 = vsyncpa [#allocation3 + $0x1], 0 }
   0x2   :  { %10 = vsyncpa [#allocation6], 0 }
   0x3   :  { %12 = vsyncpa [#allocation6 + $0x1], 0 }
   0x4   :  { %13 = vsyncpa [#allocation4], 0 }
   0x5   :  { %15 = vsyncpa [#allocation4 + $0x1], 0  ;;  %s732_s9 = smov 0   ;;  %s734_s10 = smov 0  }
   0x6   :  { %s736_s11 = smov 0   ;;  %s738_s12 = smov 0  }
   0x7   :  { %s740_s13 = smov 0   ;;  %s742_s14 = smov 0  }
   0x8   :  { %s744_s15 = smov 0   ;;  %s746_s16 = smov 0  }
   0x9 LB: > { %s414_s17 = sadd.s32 4294967295, %s707_s16   ;;  %s415_s18 = sadd.s32 4294967294, %s707_s16   ;;  %s707_s16 = sphi %s746_s16, %s21_s16   ;;  %s703_s15 = sphi %s744_s15, %s934_s15   ;;  %s699_s14 = sphi %s742_s14, %s933_s14   ;;  %s695_s13 = sphi %s740_s13, %s932_s13   ;;  %s691_s12 = sphi %s738_s12, %s931_s12   ;;  %s687_s11 = sphi %s736_s11, %s930_s11   ;;  %s683_s10 = sphi %s734_s10, %s899_s10   ;;  %s679_s9 = sphi %s732_s9, %s929_s9  }
   0xa   : > { %s30_s19 = sadd.s32 1, %s703_s15  ;;  %s42_s20 = sadd.s32 1, %s695_s13 }
   0xb   : > { %p31_p0 = scmp.ge.s32.totalorder %s30_s19, 2  ;;  %p49_p1 = scmp.ne.s32.totalorder %s695_s13, %s691_s12 }
   0xc   : > { %p50_p2 = scmp.eq.s32.totalorder %s707_s16, 0  ;;  %p55_p3 = scmp.ne.s32.totalorder %s691_s12, %s687_s11 }
   0xd   : > { %s936_s19 = smov (%p31_p0, %s30_s19), 0  ;;  %p789_p5 = scmp.eq.s32.totalorder %s414_s17, 0 }
   0xe   : > { %p785_p4 = por %p50_p2, %p49_p1  ;;  %s38_s23 = ssub.s32 %s703_s15, %s936_s19 }
   0xf   : > { %p115_p6 = scmp.eq.s32.totalorder %s414_s17, 1  ;;  %p40_p7 = scmp.eq.s32.totalorder %s38_s23, 0 }
  0x10   : > { %p797_p8 = por %p789_p5, %p55_p3  ;;  %p121_p10 = scmp.eq.s32.totalorder %s415_s18, 1 }
  0x11   : > { %p801_p9 = por %p115_p6, %p49_p1  ;;  %p453_p13 = scmp.lt.s32.totalorder %s707_s16, 2 }
  0x12   : > { %s806_s26 = scalar_select %p40_p7, %s695_s13, %s42_s20  }
  0x13   : > { %p808_p11 = por %p121_p10, %p55_p3  ;;  %s141_s28 = sand.u32 1, %s695_s13  }
  0x14   : > { %s420_s29 = sshll.u32 %s141_s28, 4  ;;  %s421_s30 = sshll.u32 %s703_s15, 3 }
  0x15   : > { %s151_s5 = scalar_lea.hbm %s918_s0, %s421_s30  ;;  %s145_s6 = scalar_lea.vmem [#allocation2], %s420_s29 }
  0x16   : > { %s154_s7 = sshll.u32 %s145_s6, 4  ;;  %s152_s8 = sshll.u32 %s151_s5, 4  ;;  %s155_s7 = int_to_ptr.vmem [resolvable:$true] %s154_s7  ;;  %s153_s8 = int_to_ptr.hbm [resolvable:$true] %s152_s8 }
  0x17   : > { %p443_p0 = pnand %p453_p13, %p785_p4  ;;  %s142_s17 = scalar_lea.sflag [#allocation3], %s141_s28 }
  0x18   : > { %s709_s18 = smov 256   ;;  %s710_s20 = smov 128  }
  0x19   : > { %s711_s23 = smov 8   ;;  %p425_p1 = scmp.ge.s32.totalorder %s707_s16, 1 }
  0x1a   : > { %445 = dma.hbm_to_vmem [thread:$0]  (!%p443_p0), %s153_s8, 256, %s155_s7, %s142_s17, %s709_s18, %s710_s20, %s711_s23  }
  0x1b   : > { %p188_p3 = scmp.lt.s32.totalorder %s707_s16, 3  ;;  %p676_p7 = scmp.ne.s32.totalorder %s683_s10, 0 }
  0x1c   : > { %p89_p10 = scmp.ne.s32.totalorder %s683_s10, %s679_s9  ;;  %s178_s3 = sshll.u32 %s919_s1, 4  ;;  %s179_s3 = int_to_ptr.hbm [resolvable:$true] %s178_s3 }
  0x1d   : > { %p827_p6 = pnand %p425_p1, %p188_p3  ;;  %p85_p12 = por %p676_p7, %p50_p2 }
  0x1e   : > { %p838_p4 = por %p89_p10, %p789_p5  ;;  %s712_s4 = smov [#allocation5]  }
  0x1f   : > { %s180_s5 = sshll.u32 %s712_s4, 4  ;;  %p446_p0 = pnand %p453_p13, %p85_p12  ;;  %s181_s5 = int_to_ptr.vmem [resolvable:$true] %s180_s5 }
  0x20   : > { %s570_s6 = sshra.s32 %s179_s3, 4  ;;  %s571_s6 = int_to_ptr.hbm [resolvable:$true] %s570_s6 }
  0x21   : > { %s572_s9 = scalar_lea.hbm %s571_s6, 16  ;;  %p574_p2 = pneg %p446_p0 }
  0x22   : > { %p573_p1 = scmp.ne.s32.totalorder %s571_s6, %s572_s9  ;;  %p578_p7 = scmp.lt.s32.totalorder %s571_s6, %s919_s1 }
  0x24   : > { %p575_p3 = pnand %p574_p2, %p573_p1 }
  0x26   : > { %p576_p5 = pneg %p575_p3 }
  0x28   : > { %p581_p10 = pnand %p578_p7, %p576_p5 }
  0x2a   : > { %584 = shalt.err (!%p581_p10)
}
  0x2b   : > { %448 = dma.hbm_to_vmem [thread:$0]  (!%p446_p0), %s179_s3, 256, %s181_s5, [#allocation6], %s709_s18, %s710_s20, %s711_s23  }
  0x2c   : > { %192 = sbr.rel (%p827_p6) target bundleno = 186 (0xba), region = 28  ;;  %s855_s8 = sand.u32 (!%p827_p6), 1, %s691_s12  }
  0x2d   : > { %s426_s17 = sshll.u32 (!%p827_p6), %s855_s8, 4  ;;  %s195_s28 = scalar_lea.sflag (!%p827_p6), [#allocation3], %s855_s8 }
  0x2e   : > { %s198_s30 = scalar_lea.vmem (!%p827_p6), [#allocation2], %s426_s17 }
  0x31   : > { %665 = dma.done.wait (%p797_p8), %s195_s28, 256  }
  0x32   : > { %667 = vsyncadd (%p797_p8), %s195_s28, 4294967040  ;;  %s204_s18 = sand.u32 1, %s683_s10  }
  0x33   : > { %s864_s20 = sshll.u32 %s204_s18, 4  ;;  %s205_s23 = scalar_lea.sflag [#allocation6], %s204_s18 }
  0x34   : > { %s208_s29 = scalar_lea.vmem [#allocation5], %s864_s20 }
  0x35   : > { %669 = dma.done.wait (%p838_p4), %s205_s23, 256  }
  0x36   : > { %671 = vsyncadd (%p838_p4), %s205_s23, 4294967040  ;;  %p243_p12 = scmp.eq.s32.totalorder %s699_s14, 0  ;;  %v238_v0 = vld [vmem:[%s198_s30] sm:$0xff]  ;;  %s713_s24 = smov 1   ;;  %v428_v1 = vld [vmem:[%s198_s30 + $0x8] sm:$0xff]  ;;  %v249_v2 = vlaneseq }
  0x37   : > { %273 = vrot.lane.b32.xlu0 %v238_v0, %s713_s24  ;;  %s429_s4 = sshll.u32 %s699_s14, 3  ;;  %v260_v5 = vrot.slane %v238_v0, 7  ;;  %s435_s21 = smul.u32 24, %s855_s8  ;;  %v278_v13 = vrot.slane %v428_v1, 7 }
  0x38   : > { %s535_s3 = scalar_select %p243_p12, 0, 255  ;;  %v250_v4 = vshrl.u32 %v249_v2, 7  ;;  %v252_v12 = vand.u32 127, %v249_v2 }
  0x39   : > { %s255_s5 = ssub.s32 15, %s429_s4  ;;  %s234_s6 = scalar_lea.vmem [#allocation7], %s435_s21 }
  0x3a   : > { %v536_v3 = vld [vmem:[%s208_s29] sm:%s535_s3]  ;;  %v256_v6 = vstv %s255_s5  ;;  %vm253_vm0 = vcmp.eq.s32.totalorder %v250_v4, 0  ;;  %vm259_vm2 = vcmp.eq.s32.totalorder %v252_v12, 15  ;;  %vm258_vm3 = vcmp.eq.s32.totalorder %v252_v12, 0  ;;  %s300_s22 = scalar_lea.hbm %s920_s2, %s429_s4  ;;  %s301_s7 = sshll.u32 %s234_s6, 4  ;;  %s302_s7 = int_to_ptr.vmem [resolvable:$true] %s301_s7 }
  0x3b   : > { %v261_v7 = vperm.slane %v536_v3, 7  ;;  %vm257_vm1 = vcmp.eq.s32.totalorder %v250_v4, %v256_v6  ;;  %v539_v11 = vld [vmem:[%s208_s29 + $0x8] sm:%s535_s3]  ;;  %v276_v17 = vsel %vm259_vm2, 0.0, %v238_v0  ;;  %s303_s17 = sshll.u32 %s300_s22, 4  ;;  %v269_v24 = vsel %vm259_vm2, 0.0, %v428_v1  ;;  %s288_s28 = scalar_lea.sflag [#allocation4], %s855_s8  ;;  %s304_s17 = int_to_ptr.hbm [resolvable:$true] %s303_s17 }
  0x3c   : > { %v263_v9 = vsel %vm257_vm1, 0.0, %v238_v0  ;;  %v279_v14 = vperm.slane %v539_v11, 7  ;;  %v281_v16 = vsel %vm257_vm1, 0.0, %v428_v1  ;;  %s614_s30 = sshra.s32 %s304_s17, 4  ;;  %s620_s29 = scalar_lea.hbm %s920_s2, 48  ;;  %s615_s30 = int_to_ptr.hbm [resolvable:$true] %s614_s30 }
  0x3d   : > { %v262_v8 = vsel %vm253_vm0, %v261_v7, %v260_v5  ;;  %s616_s18 = scalar_lea.hbm %s615_s30, 24  ;;  %p621_p4 = scmp.lt.s32.totalorder %s615_s30, %s920_s2 }
  0x3e   : > { %v264_v10 = vsub.f32 %v262_v8, %v263_v9  ;;  %v280_v15 = vsel %vm253_vm0, %v279_v14, %v278_v13  ;;  %p617_p8 = scmp.ne.s32.totalorder %s615_s30, %s616_s18  ;;  %p622_p0 = scmp.lt.s32.totalorder %s620_s29, %s616_s18 }
  0x3f   : > { %266 = vrot.lane.b32.xlu0 %v428_v1, %s713_s24  ;;  %v282_v18 = vsub.f32 %v280_v15, %v281_v16 }
  0x40   : > { %265 = vst [vmem:[%s234_s6] sm:$0xff] %v264_v10  ;;  %p618_p13 = pnand %p617_p8, %p801_p9  ;;  %p623_p1 = por %p622_p0, %p621_p4 }
  0x42   : > { %p619_p6 = pneg %p618_p13 }
  0x44   : > { %p624_p2 = pnand %p623_p1, %p619_p6 }
  0xa9   : > { %v274_v19 = vpop.permute.xlu0 %273 }
  0xaa   : > { %v275_v20 = vsel %vm258_vm3, 0.0, %v274_v19 }
  0xab   : > { %v277_v21 = vsub.f32 %v275_v20, %v276_v17 }
  0xad   : > { %v283_v22 = vadd.f32 %v282_v18, %v277_v21 }
  0xaf   : > { %v284_v23 = vmul.f32 0.5, %v283_v22 }
  0xb1   : > { %431 = vst [vmem:[%s234_s6 + $0x10] sm:$0xff] %v284_v23  ;;  %v267_v25 = vpop.permute.xlu0 %266 }
  0xb2   : > { %v268_v26 = vsel %vm258_vm3, 0.0, %v267_v25 }
  0xb3   : > { %v270_v27 = vsub.f32 %v268_v26, %v269_v24 }
  0xb5   : > { %430 = vst [vmem:[%s234_s6 + $0x8] sm:$0xff] %v270_v27 }
  0xb6   : > { %627 = shalt.err (!%p624_p2)
}
  0xb7   : > { %s714_s8 = smov 128   ;;  %s715_s4 = smov 256  }
  0xb8   : > { %s716_s5 = smov 8  }
  0xb9   : > { %440 = dma.vmem_to_hbm [thread:$0]  (%p801_p9), %s302_s7, 384, %s304_s17, %s288_s28, %s714_s8, %s715_s4, %s716_s5  }
  0xba PF: > { %s318_s21 = sand.u32 1, %s687_s11   ;;  %p928_p3 = scmp.ge.s32.totalorder %s707_s16, 2 }
  0xbb   : > { %s319_s6 = scalar_lea.sflag [#allocation4], %s318_s21 }
  0xbc   : > { %p450_p5 = pnand %p928_p3, %p808_p11 }
  0xbe   : > { %p451_p7 = pneg %p450_p5 }
  0xc0   : > { %673 = dma.done.wait (%p451_p7), %s319_s6, 384  }
  0xc1   : > { %675 = vsyncadd (%p451_p7), %s319_s6, 4294966912  ;;  %s21_s16 = sadd.s32 1, %s707_s16   ;;  %s929_s9 = smov %s683_s10 }
  0xc2   : > { %p18_p10 = scmp.ge.s32.totalorder %s21_s16, 4   ;;  %s899_s10 = smov 0  }
  0xc3   : > { %s930_s11 = smov %s691_s12  ;;  %s931_s12 = smov %s695_s13 }
  0xc4   : > { %s932_s13 = smov %s806_s26  ;;  %s933_s14 = smov %s703_s15 }
  0xc5   : > { %s934_s15 = smov %s936_s19  ;;  %20 = sbr.rel (!%p18_p10) target bundleno = 9 (0x9), region = 89 }
  0xca   :  { %325 = vsyncpa [#allocation3], 1 }
  0xcb   :  { %327 = vsyncpa [#allocation3 + $0x1], 1 }
  0xcc   :  { %328 = vsyncpa [#allocation6], 1 }
  0xcd   :  { %330 = vsyncpa [#allocation6 + $0x1], 1 }
  0xce   :  { %331 = vsyncpa [#allocation4], 1 }
  0xcf   :  { %333 = vsyncpa [#allocation4 + $0x1], 1 }

</bundles_post_ra>
